<compile_context>
chip_gen: v7x
topology: tpu7x:2x2x1
jax: 0.10.0
libtpu: 0.0.40
codegen_flags: <defaults>
</compile_context>

<pallas_src>
import jax
import jax.numpy as jnp
from jax.experimental import pallas as pl
from jax.experimental.pallas import tpu as pltpu


# ----------------------------------------------------------------------------- #
# Pallas kernel: all MixerTF_Core stages fused (Cond_Net MLPs + shift + update)
# ----------------------------------------------------------------------------- #
def _make_fused_kernel(n_stages, hidden):
    """Build the kernel for a fixed (static) stage count and hidden width."""

    def kernel(c_ref, z0_ref, w1_ref, b1_ref, w2p_ref, w2s_ref, b2_ref, z_ref):
        # c_ref   : (nb_pad, dim_c)               condition input (f32)
        # z0_ref  : (nb_pad, tn)                  initial state, this column block
        # w1_ref  : (n_stages, dim_c, 2*hidden)   [w1_pos | w1_scale] fused (f32)
        # b1_ref  : (n_stages, 1, 2*hidden)       [b1_pos | b1_scale] (f32)
        # w2p_ref : (n_stages, hidden, tn)        pos  layer-2 weights (bf16)
        # w2s_ref : (n_stages, hidden, tn)        scale layer-2 weights (bf16)
        # b2_ref  : (n_stages, 2, tn)             row 0 = pos bias, row 1 = scale bias + 1
        # z_ref   : (nb_pad, tn)                  output column block (f32)
        c = c_ref[...]
        z = z0_ref[...]
        for s in range(n_stages):  # static unroll: n_stages is tiny & compile-time
            # Cond_Net layer 1 (pos & scale branches fused in one matmul) -> SiLU.
            h1 = jnp.dot(c, w1_ref[s], preferred_element_type=jnp.float32) + b1_ref[s]
            h1 = h1 * jax.nn.sigmoid(h1)  # SiLU
            h1p = h1[:, :hidden].astype(w2p_ref.dtype)
            h1s = h1[:, hidden:].astype(w2s_ref.dtype)

            # Cond_Net layer 2: two de-zeroed bf16 matmuls, f32 accumulation.
            b2 = b2_ref[s]  # (2, tn)
            pos = jnp.dot(h1p, w2p_ref[s], preferred_element_type=jnp.float32) + b2[0:1, :]
            scl = jnp.dot(h1s, w2s_ref[s], preferred_element_type=jnp.float32) + b2[1:2, :]

            # z + (pos + scale*z) == z*(scale+1) + pos ; the '+1' is baked into b2 row 1.
            # TODO(synk): MixerTF_Block stand-in (additive shift update).
            z = z * scl + pos
        z_ref[...] = z

    return kernel


def _pick_col_block(d_model):
    """Column block width for the parallel grid axis.

    v7x has 2 TensorCores: split d_model columns in half so both cores get a
    block. v5e/v6e (single TC): one full-width block to avoid grid-step overhead.
    """
    try:
        kind = jax.devices()[0].device_kind.lower()
    except Exception:  # pragma: no cover
        kind = ""
    if "v7" in kind:
        half = d_model // 2
        if half >= 128 and half % 128 == 0:
            return half
    return d_model


# ----------------------------------------------------------------------------- #
# Wrapper: single fused pallas_call (all stages, all columns)
# ----------------------------------------------------------------------------- #
def mixer_tf_core_forward(x_in, c_in, packed, col_block=None):
    """Forward pass of MixerTF_Core.

    x_in   : (nb, d0, d1, d2)
    c_in   : (nb, dim_c) or None
    packed : dict of stacked/fused Cond_Net params (see pack_stage_params)
    """
    nb, d0, d1, d2 = x_in.shape
    d_model = d0 * d1 * d2
    z0 = x_in.reshape(nb, d_model).astype(jnp.float32)

    if c_in is None:
        # shift == 0 every stage; with the additive MixerTF_Block stand-in the
        # state is unchanged.
        return z0.reshape(nb, d0, d1, d2)

    n_stages, dim_c, two_h = packed["w1"].shape
    hidden = two_h // 2

    if col_block is None:
        col_block = _pick_col_block(d_model)
    assert d_model % col_block == 0
    n_cols = d_model // col_block

    # Pad batch up to a sublane multiple (8) -> unmasked vregs/stores.  Padded
    # rows hold garbage (silu(b1)@w2 + b2 driven) and are sliced away below.
    nb_pad = -(-nb // 8) * 8
    z0_p = jnp.zeros((nb_pad, d_model), jnp.float32).at[:nb].set(z0)
    c_p = jnp.zeros((nb_pad, dim_c), jnp.float32).at[:nb].set(c_in.astype(jnp.float32))

    grid_spec = pltpu.PrefetchScalarGridSpec(
        num_scalar_prefetch=0,
        grid=(n_cols,),
        in_specs=[
            pl.BlockSpec((nb_pad, dim_c), lambda j: (0, 0)),                   # c
            pl.BlockSpec((nb_pad, col_block), lambda j: (0, j)),               # z0 col
            pl.BlockSpec((n_stages, dim_c, two_h), lambda j: (0, 0, 0)),       # W1 (all)
            pl.BlockSpec((n_stages, 1, two_h), lambda j: (0, 0, 0)),           # B1 (all)
            pl.BlockSpec((n_stages, hidden, col_block), lambda j: (0, 0, j)),  # W2 pos
            pl.BlockSpec((n_stages, hidden, col_block), lambda j: (0, 0, j)),  # W2 scale
            pl.BlockSpec((n_stages, 2, col_block), lambda j: (0, 0, j)),       # B2
        ],
        out_specs=pl.BlockSpec((nb_pad, col_block), lambda j: (0, j)),
    )

    z_out = pl.pallas_call(
        _make_fused_kernel(n_stages, hidden),
        out_shape=jax.ShapeDtypeStruct((nb_pad, d_model), jnp.float32),
        grid_spec=grid_spec,
        # Donate the padded z0 buffer as the output allocation (no extra HBM buf).
        input_output_aliases={1: 0},
        compiler_params=pltpu.CompilerParams(
            dimension_semantics=("parallel",)),
    )(c_p, z0_p, packed["w1"], packed["b1"], packed["w2p"], packed["w2s"],
      packed["b2"])

    return z_out[:nb].reshape(nb, d0, d1, d2)


# ----------------------------------------------------------------------------- #
# Parameter construction (synthetic Cond_Net init) and fused packing
# ----------------------------------------------------------------------------- #
def init_cond_net_params(key, dim_c, d_model, hidden=32, gain=1.4):
    """Deterministic synthetic init of Cond_Net linear_pos / linear_scale params."""
    ks = jax.random.split(key, 8)
    s1 = gain / jnp.sqrt(dim_c)
    s2 = gain / jnp.sqrt(hidden)
    return {
        "w1p": jax.random.normal(ks[0], (dim_c, hidden), jnp.float32) * s1,
        "b1p": jax.random.normal(ks[1], (hidden,), jnp.float32) * 0.1,
        "w2p": jax.random.normal(ks[2], (hidden, d_model), jnp.float32) * s2,
        "b2p": jax.random.normal(ks[3], (d_model,), jnp.float32) * 0.1,
        "w1s": jax.random.normal(ks[4], (dim_c, hidden), jnp.float32) * s1,
        "b1s": jax.random.normal(ks[5], (hidden,), jnp.float32) * 0.1,
        "w2s": jax.random.normal(ks[6], (hidden, d_model), jnp.float32) * s2,
        "b2s": jax.random.normal(ks[7], (d_model,), jnp.float32) * 0.1,
    }


def pack_stage_params(stage_params):
    """Stack per-stage params and fuse/prepare them for the single kernel.

    * layer-1 pos/scale weights fused along the output axis (one matmul).
    * layer-2 weights kept separate (de-zeroed) and cast to bf16.
    * '+1' of the state update baked into the scale bias (b2 row 1).
    """
    w1 = jnp.stack([jnp.concatenate([p["w1p"], p["w1s"]], axis=1)
                    for p in stage_params])                                   # (S, dc, 2h)
    b1 = jnp.stack([jnp.concatenate([p["b1p"], p["b1s"]])[None, :]
                    for p in stage_params])                                   # (S, 1, 2h)
    w2p = jnp.stack([p["w2p"] for p in stage_params]).astype(jnp.bfloat16)    # (S, h, d)
    w2s = jnp.stack([p["w2s"] for p in stage_params]).astype(jnp.bfloat16)    # (S, h, d)
    b2 = jnp.stack([jnp.stack([p["b2p"], p["b2s"] + 1.0])
                    for p in stage_params])                                   # (S, 2, d)
    return {"w1": w1, "b1": b1, "w2p": w2p, "w2s": w2s, "b2": b2}


# ----------------------------------------------------------------------------- #
# Pure-JAX reference (unfused, per-branch math, f32 HIGHEST) for correctness
# ----------------------------------------------------------------------------- #
def reference_forward(x_in, c_in, stage_params):
    nb, d0, d1, d2 = x_in.shape
    z0 = x_in.astype(jnp.float32)
    hp = jax.lax.Precision.HIGHEST
    for p in stage_params:
        h = jax.nn.silu(jnp.dot(c_in, p["w1p"], precision=hp) + p["b1p"])
        pos = (jnp.dot(h, p["w2p"], precision=hp) + p["b2p"]).reshape(nb, d0, d1, d2)
        h = jax.nn.silu(jnp.dot(c_in, p["w1s"], precision=hp) + p["b1s"])
        scale = (jnp.dot(h, p["w2s"], precision=hp) + p["b2s"]).reshape(nb, d0, d1, d2)
        shift = pos + scale * z0
        z0 = z0 + shift   # TODO(synk): MixerTF_Block stand-in (additive shift)
    return z0


# ----------------------------------------------------------------------------- #
# Main
# ----------------------------------------------------------------------------- #
if __name__ == "__main__":
    # Configuration (chosen so the identity Mixer3D stand-in is shape-consistent):
    #   dim_v = dim_r = dim_a = [8, 8, 8] -> 2 MixerTF_Block stages
    #   Cond_Net cond dims [8, 16, 8]     -> d_model = 8*8*8 = 512
    nb = 2
    dim_v = [8, 8, 8]
    dim_r = [8, 8, 8]
    dim_a = [8, 8, 8]
    dim_c = 8
    hidden = 32

    n_stages = len(dim_r) - 1            # 2
    d_model = dim_v[0] * dim_r[0] * dim_a[0]   # 512

    key = jax.random.PRNGKey(0)
    k_x, k_c, k_p = jax.random.split(key, 3)

    x_in = jax.random.normal(k_x, (nb, dim_v[0], dim_r[0], dim_a[0]), jnp.float32)
    c_in = jax.random.normal(k_c, (nb, dim_c), jnp.float32)

    stage_keys = jax.random.split(k_p, n_stages)
    stage_params = [init_cond_net_params(stage_keys[i], dim_c, d_model, hidden)
                    for i in range(n_stages)]
    packed = pack_stage_params(stage_params)

    fwd = jax.jit(mixer_tf_core_forward)
    out = fwd(x_in, c_in, packed)
    jax.block_until_ready(out)

    assert out.shape == (nb, dim_v[0], dim_r[0], dim_a[0])
    assert bool(jnp.all(jnp.isfinite(out)))

    # Kernel uses bf16 layer-2 weights (f32 accumulation); reference is f32
    # HIGHEST precision, so compare with a norm-relative tolerance (~1e-3 expected).
    ref = reference_forward(x_in, c_in, stage_params)
    max_err = float(jnp.max(jnp.abs(out - ref)))
    ref_scale = float(jnp.max(jnp.abs(ref)))
    assert max_err <= 2e-2 * max(ref_scale, 1.0), (
        f"mismatch vs reference: max abs diff = {max_err}, ref scale = {ref_scale}")

    print("KERNEL_OK")
</pallas_src>

<mosaic_0001>
module attributes {stable_mosaic.version = 11 : i64} {
  func.func @kernel(%arg0: i32, %arg1: memref<8x8xf32, #tpu.memory_space<vmem>>, %arg2: memref<8x512xf32, #tpu.memory_space<vmem>>, %arg3: memref<2x8x64xf32, #tpu.memory_space<vmem>>, %arg4: memref<2x1x64xf32, #tpu.memory_space<vmem>>, %arg5: memref<2x32x512xbf16, #tpu.memory_space<vmem>>, %arg6: memref<2x32x512xbf16, #tpu.memory_space<vmem>>, %arg7: memref<2x2x512xf32, #tpu.memory_space<vmem>>, %arg8: memref<8x512xf32, #tpu.memory_space<vmem>>) attributes {dimension_semantics = [#tpu.dimension_semantics<parallel>], iteration_bounds = array<i64: 1>, scalar_prefetch = 0 : i64, scratch_operands = 0 : i64, tpu.core_type = #tpu.core_type<tc>, window_params = [{pipeline_mode = #tpu.pipeline_mode<synchronous>, transform_indices = @transform_0, window_bounds = array<i64: 8, 8>}, {transform_indices = @transform_1, window_bounds = array<i64: 8, 512>}, {pipeline_mode = #tpu.pipeline_mode<synchronous>, transform_indices = @transform_2, window_bounds = array<i64: 2, 8, 64>}, {pipeline_mode = #tpu.pipeline_mode<synchronous>, transform_indices = @transform_3, window_bounds = array<i64: 2, 1, 64>}, {transform_indices = @transform_4, window_bounds = array<i64: 2, 32, 512>}, {transform_indices = @transform_5, window_bounds = array<i64: 2, 32, 512>}, {transform_indices = @transform_6, window_bounds = array<i64: 2, 2, 512>}, {transform_indices = @transform_7, window_bounds = array<i64: 8, 512>}]} {
    %c0 = arith.constant 0 : index
    %c0_0 = arith.constant 0 : index
    %0 = vector.load %arg1[%c0, %c0_0] : memref<8x8xf32, #tpu.memory_space<vmem>>, vector<8x8xf32>
    %c0_1 = arith.constant 0 : index
    %c0_2 = arith.constant 0 : index
    %1 = vector.load %arg2[%c0_1, %c0_2] : memref<8x512xf32, #tpu.memory_space<vmem>>, vector<8x512xf32>
    %c0_3 = arith.constant 0 : index
    %c0_4 = arith.constant 0 : index
    %c0_5 = arith.constant 0 : index
    %2 = vector.load %arg3[%c0_3, %c0_4, %c0_5] : memref<2x8x64xf32, #tpu.memory_space<vmem>>, vector<1x8x64xf32>
    %3 = vector.shape_cast %2 : vector<1x8x64xf32> to vector<8x64xf32>
    %cst = arith.constant dense<0.000000e+00> : vector<8x64xf32>
    %4 = tpu.matmul %0, %3, %cst {dimension_numbers = #tpu.dot_dimension_numbers<[1], [0], [0], [1], [0, 0, 1, 1], [], []>} : vector<8x8xf32>, vector<8x64xf32>, vector<8x64xf32> -> vector<8x64xf32>
    %c0_6 = arith.constant 0 : index
    %c0_7 = arith.constant 0 : index
    %c0_8 = arith.constant 0 : index
    %5 = vector.load %arg4[%c0_6, %c0_7, %c0_8] : memref<2x1x64xf32, #tpu.memory_space<vmem>>, vector<1x1x64xf32>
    %6 = vector.shape_cast %5 : vector<1x1x64xf32> to vector<1x64xf32>
    %7 = vector.broadcast %6 : vector<1x64xf32> to vector<8x64xf32>
    %8 = arith.addf %4, %7 : vector<8x64xf32>
    %9 = arith.negf %8 : vector<8x64xf32>
    %10 = math.exp %9 : vector<8x64xf32>
    %cst_9 = arith.constant 1.000000e+00 : f32
    %11 = vector.broadcast %cst_9 : f32 to vector<8x64xf32>
    %12 = arith.addf %11, %10 : vector<8x64xf32>
    %13 = arith.divf %11, %12 : vector<8x64xf32>
    %14 = arith.mulf %8, %13 : vector<8x64xf32>
    %15 = vector.extract_strided_slice %14 {offsets = [0, 0], sizes = [8, 32], strides = [1, 1]} : vector<8x64xf32> to vector<8x32xf32>
    %16 = arith.truncf %15 : vector<8x32xf32> to vector<8x32xbf16>
    %17 = vector.extract_strided_slice %14 {offsets = [0, 32], sizes = [8, 32], strides = [1, 1]} : vector<8x64xf32> to vector<8x32xf32>
    %18 = arith.truncf %17 : vector<8x32xf32> to vector<8x32xbf16>
    %c0_10 = arith.constant 0 : index
    %c0_11 = arith.constant 0 : index
    %c0_12 = arith.constant 0 : index
    %19 = vector.load %arg7[%c0_10, %c0_11, %c0_12] : memref<2x2x512xf32, #tpu.memory_space<vmem>>, vector<1x2x512xf32>
    %20 = vector.shape_cast %19 : vector<1x2x512xf32> to vector<2x512xf32>
    %c0_13 = arith.constant 0 : index
    %c0_14 = arith.constant 0 : index
    %c0_15 = arith.constant 0 : index
    %21 = vector.load %arg5[%c0_13, %c0_14, %c0_15] : memref<2x32x512xbf16, #tpu.memory_space<vmem>>, vector<1x32x512xbf16>
    %22 = vector.shape_cast %21 : vector<1x32x512xbf16> to vector<32x512xbf16>
    %cst_16 = arith.constant dense<0.000000e+00> : vector<8x512xf32>
    %23 = tpu.matmul %16, %22, %cst_16 {dimension_numbers = #tpu.dot_dimension_numbers<[1], [0], [0], [1], [0, 0, 1, 1], [], []>} : vector<8x32xbf16>, vector<32x512xbf16>, vector<8x512xf32> -> vector<8x512xf32>
    %24 = vector.extract_strided_slice %20 {offsets = [0, 0], sizes = [1, 512], strides = [1, 1]} : vector<2x512xf32> to vector<1x512xf32>
    %25 = vector.broadcast %24 : vector<1x512xf32> to vector<8x512xf32>
    %26 = arith.addf %23, %25 : vector<8x512xf32>
    %c0_17 = arith.constant 0 : index
    %c0_18 = arith.constant 0 : index
    %c0_19 = arith.constant 0 : index
    %27 = vector.load %arg6[%c0_17, %c0_18, %c0_19] : memref<2x32x512xbf16, #tpu.memory_space<vmem>>, vector<1x32x512xbf16>
    %28 = vector.shape_cast %27 : vector<1x32x512xbf16> to vector<32x512xbf16>
    %cst_20 = arith.constant dense<0.000000e+00> : vector<8x512xf32>
    %29 = tpu.matmul %18, %28, %cst_20 {dimension_numbers = #tpu.dot_dimension_numbers<[1], [0], [0], [1], [0, 0, 1, 1], [], []>} : vector<8x32xbf16>, vector<32x512xbf16>, vector<8x512xf32> -> vector<8x512xf32>
    %30 = vector.extract_strided_slice %20 {offsets = [1, 0], sizes = [1, 512], strides = [1, 1]} : vector<2x512xf32> to vector<1x512xf32>
    %31 = vector.broadcast %30 : vector<1x512xf32> to vector<8x512xf32>
    %32 = arith.addf %29, %31 : vector<8x512xf32>
    %33 = arith.mulf %1, %32 : vector<8x512xf32>
    %34 = arith.addf %33, %26 : vector<8x512xf32>
    %c1 = arith.constant 1 : index
    %c0_21 = arith.constant 0 : index
    %c0_22 = arith.constant 0 : index
    %35 = vector.load %arg3[%c1, %c0_21, %c0_22] : memref<2x8x64xf32, #tpu.memory_space<vmem>>, vector<1x8x64xf32>
    %36 = vector.shape_cast %35 : vector<1x8x64xf32> to vector<8x64xf32>
    %cst_23 = arith.constant dense<0.000000e+00> : vector<8x64xf32>
    %37 = tpu.matmul %0, %36, %cst_23 {dimension_numbers = #tpu.dot_dimension_numbers<[1], [0], [0], [1], [0, 0, 1, 1], [], []>} : vector<8x8xf32>, vector<8x64xf32>, vector<8x64xf32> -> vector<8x64xf32>
    %c1_24 = arith.constant 1 : index
    %c0_25 = arith.constant 0 : index
    %c0_26 = arith.constant 0 : index
    %38 = vector.load %arg4[%c1_24, %c0_25, %c0_26] : memref<2x1x64xf32, #tpu.memory_space<vmem>>, vector<1x1x64xf32>
    %39 = vector.shape_cast %38 : vector<1x1x64xf32> to vector<1x64xf32>
    %40 = vector.broadcast %39 : vector<1x64xf32> to vector<8x64xf32>
    %41 = arith.addf %37, %40 : vector<8x64xf32>
    %42 = arith.negf %41 : vector<8x64xf32>
    %43 = math.exp %42 : vector<8x64xf32>
    %cst_27 = arith.constant 1.000000e+00 : f32
    %44 = vector.broadcast %cst_27 : f32 to vector<8x64xf32>
    %45 = arith.addf %44, %43 : vector<8x64xf32>
    %46 = arith.divf %44, %45 : vector<8x64xf32>
    %47 = arith.mulf %41, %46 : vector<8x64xf32>
    %48 = vector.extract_strided_slice %47 {offsets = [0, 0], sizes = [8, 32], strides = [1, 1]} : vector<8x64xf32> to vector<8x32xf32>
    %49 = arith.truncf %48 : vector<8x32xf32> to vector<8x32xbf16>
    %50 = vector.extract_strided_slice %47 {offsets = [0, 32], sizes = [8, 32], strides = [1, 1]} : vector<8x64xf32> to vector<8x32xf32>
    %51 = arith.truncf %50 : vector<8x32xf32> to vector<8x32xbf16>
    %c1_28 = arith.constant 1 : index
    %c0_29 = arith.constant 0 : index
    %c0_30 = arith.constant 0 : index
    %52 = vector.load %arg7[%c1_28, %c0_29, %c0_30] : memref<2x2x512xf32, #tpu.memory_space<vmem>>, vector<1x2x512xf32>
    %53 = vector.shape_cast %52 : vector<1x2x512xf32> to vector<2x512xf32>
    %c1_31 = arith.constant 1 : index
    %c0_32 = arith.constant 0 : index
    %c0_33 = arith.constant 0 : index
    %54 = vector.load %arg5[%c1_31, %c0_32, %c0_33] : memref<2x32x512xbf16, #tpu.memory_space<vmem>>, vector<1x32x512xbf16>
    %55 = vector.shape_cast %54 : vector<1x32x512xbf16> to vector<32x512xbf16>
    %cst_34 = arith.constant dense<0.000000e+00> : vector<8x512xf32>
    %56 = tpu.matmul %49, %55, %cst_34 {dimension_numbers = #tpu.dot_dimension_numbers<[1], [0], [0], [1], [0, 0, 1, 1], [], []>} : vector<8x32xbf16>, vector<32x512xbf16>, vector<8x512xf32> -> vector<8x512xf32>
    %57 = vector.extract_strided_slice %53 {offsets = [0, 0], sizes = [1, 512], strides = [1, 1]} : vector<2x512xf32> to vector<1x512xf32>
    %58 = vector.broadcast %57 : vector<1x512xf32> to vector<8x512xf32>
    %59 = arith.addf %56, %58 : vector<8x512xf32>
    %c1_35 = arith.constant 1 : index
    %c0_36 = arith.constant 0 : index
    %c0_37 = arith.constant 0 : index
    %60 = vector.load %arg6[%c1_35, %c0_36, %c0_37] : memref<2x32x512xbf16, #tpu.memory_space<vmem>>, vector<1x32x512xbf16>
    %61 = vector.shape_cast %60 : vector<1x32x512xbf16> to vector<32x512xbf16>
    %cst_38 = arith.constant dense<0.000000e+00> : vector<8x512xf32>
    %62 = tpu.matmul %51, %61, %cst_38 {dimension_numbers = #tpu.dot_dimension_numbers<[1], [0], [0], [1], [0, 0, 1, 1], [], []>} : vector<8x32xbf16>, vector<32x512xbf16>, vector<8x512xf32> -> vector<8x512xf32>
    %63 = vector.extract_strided_slice %53 {offsets = [1, 0], sizes = [1, 512], strides = [1, 1]} : vector<2x512xf32> to vector<1x512xf32>
    %64 = vector.broadcast %63 : vector<1x512xf32> to vector<8x512xf32>
    %65 = arith.addf %62, %64 : vector<8x512xf32>
    %66 = arith.mulf %34, %65 : vector<8x512xf32>
    %67 = arith.addf %66, %59 : vector<8x512xf32>
    %c0_39 = arith.constant 0 : index
    %c0_40 = arith.constant 0 : index
    %68 = vector.load %arg8[%c0_39, %c0_40] : memref<8x512xf32, #tpu.memory_space<vmem>>, vector<8x512xf32>
    tpu.vector_store %arg8[%c0_39, %c0_40], %67 {strides = array<i32>} : memref<8x512xf32, #tpu.memory_space<vmem>>, vector<8x512xf32>,
    return
  }
  func.func @transform_0(%arg0: i32) -> (i32, i32) {
    %c0_i32 = arith.constant 0 : i32
    %c0_i32_0 = arith.constant 0 : i32
    %c0_i32_1 = arith.constant 0 : i32
    return %c0_i32, %c0_i32_0 : i32, i32
  }
  func.func @transform_1(%arg0: i32) -> (i32, i32) {
    %c0_i32 = arith.constant 0 : i32
    %c0_i32_0 = arith.constant 0 : i32
    return %c0_i32, %arg0 : i32, i32
  }
  func.func @transform_2(%arg0: i32) -> (i32, i32, i32) {
    %c0_i32 = arith.constant 0 : i32
    %c0_i32_0 = arith.constant 0 : i32
    %c0_i32_1 = arith.constant 0 : i32
    %c0_i32_2 = arith.constant 0 : i32
    return %c0_i32, %c0_i32_0, %c0_i32_1 : i32, i32, i32
  }
  func.func @transform_3(%arg0: i32) -> (i32, i32, i32) {
    %c0_i32 = arith.constant 0 : i32
    %c0_i32_0 = arith.constant 0 : i32
    %c0_i32_1 = arith.constant 0 : i32
    %c0_i32_2 = arith.constant 0 : i32
    return %c0_i32, %c0_i32_0, %c0_i32_1 : i32, i32, i32
  }
  func.func @transform_4(%arg0: i32) -> (i32, i32, i32) {
    %c0_i32 = arith.constant 0 : i32
    %c0_i32_0 = arith.constant 0 : i32
    %c0_i32_1 = arith.constant 0 : i32
    return %c0_i32, %c0_i32_0, %arg0 : i32, i32, i32
  }
  func.func @transform_5(%arg0: i32) -> (i32, i32, i32) {
    %c0_i32 = arith.constant 0 : i32
    %c0_i32_0 = arith.constant 0 : i32
    %c0_i32_1 = arith.constant 0 : i32
    return %c0_i32, %c0_i32_0, %arg0 : i32, i32, i32
  }
  func.func @transform_6(%arg0: i32) -> (i32, i32, i32) {
    %c0_i32 = arith.constant 0 : i32
    %c0_i32_0 = arith.constant 0 : i32
    %c0_i32_1 = arith.constant 0 : i32
    return %c0_i32, %c0_i32_0, %arg0 : i32, i32, i32
  }
  func.func @transform_7(%arg0: i32) -> (i32, i32) {
    %c0_i32 = arith.constant 0 : i32
    %c0_i32_0 = arith.constant 0 : i32
    return %c0_i32, %arg0 : i32, i32
  }
}

</mosaic_0001>

<bundles_post_ra>
// kernel: mixer_tf_core_forward.1
= control target key start
LH: loop header
LB: loop body
LE: loop exit
PB: predicated region body
PF: predicated region fallthrough
CT: control target
= control target key end

     0   :  { %12 = vsyncpa [#allocation3], 0  ;;  %s1097_s24 = smov [#allocation2]   ;;  %s1361_s0 = inlined_call_operand.vmem [shape: f32[8,8], index: 0, kind: input, shape index: {}]   ;;  %s1362_s1 = inlined_call_operand.vmem [shape: f32[8,512], index: 1, kind: input, shape index: {}, may-alias: {1,7}]   ;;  %s1363_s2 = inlined_call_operand.vmem [shape: f32[2,8,64], index: 2, kind: input, shape index: {}]   ;;  %s1364_s3 = inlined_call_operand.vmem [shape: f32[2,1,64], index: 3, kind: input, shape index: {}]   ;;  %s1365_s4 = inlined_call_operand.vmem [shape: bf16[2,32,512], index: 4, kind: input, shape index: {}]   ;;  %s1366_s5 = inlined_call_operand.hbm [shape: bf16[2,32,512], index: 5, kind: input, shape index: {}]   ;;  %s1367_s6 = inlined_call_operand.vmem [shape: f32[2,2,512], index: 6, kind: input, shape index: {}]   ;;  %s1368_s7 = inlined_call_operand.vmem [shape: f32[8,512], index: 7, kind: output, shape index: {}, may-alias: {1,7}]  }
   0x1   :  { %s28_s25 = sshll.u32 %s1097_s24, 4  ;;  %s1073_s28 = scalar_lea.hbm %s1366_s5, 2048  ;;  %s29_s25 = int_to_ptr.vmem [resolvable:$true] %s28_s25 }
   0x2   :  { %p1074_p0 = scmp.ne.s32.totalorder %s1366_s5, %s1073_s28  ;;  %p1077_p1 = scmp.lt.u32.totalorder %s1073_s28, %s1366_s5 }
   0x4   :  { %p1079_p2 = pnand %p1077_p1, %p1074_p0 }
   0x6   :  { %1082 = shalt.err (!%p1079_p2)
}
   0x7   :  { %s1083_s10 = scalar_lea.vmem %s29_s25, 2048  ;;  %p1088_p4 = scmp.lt.s32.totalorder %s29_s25, %s29_s25 }
   0x8   :  { %p1084_p3 = scmp.ne.s32.totalorder %s29_s25, %s1083_s10  ;;  %p1089_p5 = scmp.lt.s32.totalorder %s1083_s10, %s1083_s10 }
   0xa   :  { %p1090_p6 = por %p1089_p5, %p1088_p4 }
   0xc   :  { %p1091_p7 = pnand %p1090_p6, %p1084_p3 }
   0xe   :  { %1094 = shalt.err (!%p1091_p7)
}
   0xf   :  { %s1098_s11 = smov 256   ;;  %s1099_s12 = smov 16  }
  0x10   :  { %34 = dma.hbm_to_vmem [thread:$0]  %s1366_s5, 2048, %s29_s25, [#allocation3], %s1098_s11, %s1098_s11, %s1099_s12  }
  0x11   :  { %1095 = dma.done.wait [#allocation3], 2048  }
  0x12   :  { %1096 = vsyncadd [#allocation3], 4294965248  ;;  %v1100_v0 = vmov 0.0   ;;  %vm1101_vm0 = vmmov 0   ;;  %vm54_vm1 = vcmask 64512   ;;  %v46_v1 = vld [vmem:[%s1363_s2] sm:$0xff]  ;;  %v146_v50 = vlaneseq }
  0x13   :  { %1000 = vmatprep.subr.mxu0 %v1100_v0  ;;  %1002 = vmatprep.mubr.msk.f32.mxu0 %vm1101_vm0, %v1100_v0  ;;  %v1165_v2 = vld [vmem:[%s1361_s0] sm:$0xff]  ;;  %v1021_v4 = vld [vmem:[%s1365_s4 + $0xc] ss:$16 sps:$4 sm:$0xff]   ;;  %v1019_v5 = vld [vmem:[%s1365_s4 + $0x8] ss:$16 sps:$4 sm:$0xff]   ;;  %v1102_v11 = vmov 0  }
  0x14   :  { %1001 = vmatpush3.msra.mxu0 %v46_v1  ;;  %v1017_v3 = vld [vmem:[%s1365_s4 + $0x4] ss:$16 sps:$4 sm:$0xff]   ;;  %v1022_v6 = vld [vmem:[%s1365_s4] ss:$16 sps:$4 sm:$0xff]   ;;  %v1027_v8 = vld [vmem:[%s1365_s4 + $0x2c] ss:$16 sps:$4 sm:$0xff]   ;;  %258 = vmatprep.mubr.bf16.mxu1 %v1102_v11 }
  0x15   :  { %1003 = vmatmul.mubr.msk.f32.vlgmr.msra.gmra.mrb[0].mxu0 %vm54_vm1, %v1165_v2  ;;  %226 = vmatprep.subr.bf16.mxu1 %v1017_v3  ;;  %v1023_v7 = vld [vmem:[%s1365_s4 + $0x24] ss:$16 sps:$4 sm:$0xff]   ;;  %v1025_v9 = vld [vmem:[%s1365_s4 + $0x28] ss:$16 sps:$4 sm:$0xff]   ;;  %v1028_v10 = vld [vmem:[%s1365_s4 + $0x20] ss:$16 sps:$4 sm:$0xff]  }
  0x16   :  { %267 = vmatprep.subr.bf16.mxu0 %v1021_v4  ;;  %227 = vmatpush1.bf16.msra.mxu1 %v1022_v6  ;;  %v1031_v12 = vld [vmem:[#allocation2 + $0x4] ss:$16 sps:$4 sm:$0xff]   ;;  %v1034_v13 = vld [vmem:[#allocation2 + $0xc] ss:$16 sps:$4 sm:$0xff]   ;;  %v939_v14 = vld [vmem:[%s1364_s3] ss:$0 sm:$0xff] }
  0x17   :  { %268 = vmatpush1.bf16.msra.mxu0 %v1019_v5  ;;  %228 = vmatprep.subr.bf16.mxu1 %v1023_v7  ;;  %vm222_vm2 = vcmask 261120   ;;  %v1029_v23 = vld [vmem:[#allocation2] ss:$16 sps:$4 sm:$0xff]   ;;  %v1032_v25 = vld [vmem:[#allocation2 + $0x8] ss:$16 sps:$4 sm:$0xff]   ;;  %s1103_s12 = smov 96  }
  0x18   :  { %269 = vmatprep.subr.bf16.mxu0 %v1027_v8  ;;  %299 = vmatprep.mubr.bf16.mxu0 %v1102_v11  ;;  %v1037_v26 = vld [vmem:[#allocation2 + $0x24] ss:$16 sps:$4 sm:$0xff]   ;;  %v1040_v27 = vld [vmem:[#allocation2 + $0x2c] ss:$16 sps:$4 sm:$0xff]   ;;  %v1035_v28 = vld [vmem:[#allocation2 + $0x20] ss:$16 sps:$4 sm:$0xff]  }
  0x19   :  { %v1038_v29 = vld [vmem:[#allocation2 + $0x28] ss:$16 sps:$4 sm:$0xff]   ;;  %v1043_v40 = vld [vmem:[%s1365_s4 + $0x44] ss:$16 sps:$4 sm:$0xff]   ;;  %v1046_v41 = vld [vmem:[%s1365_s4 + $0x4c] ss:$16 sps:$4 sm:$0xff]  }
  0x1a   :  { %229 = vmatpush1.bf16.msra.mxu1 %v1028_v10  ;;  %v962_v30 = vld [vmem:[%s1363_s2 + $0x8] sm:$0xff]  ;;  %v1041_v42 = vld [vmem:[%s1365_s4 + $0x40] ss:$16 sps:$4 sm:$0xff]   ;;  %v1049_v44 = vld [vmem:[%s1365_s4 + $0x64] ss:$16 sps:$4 sm:$0xff]   ;;  %v1247_v51 = vshrl.u32 %v146_v50, 7 }
  0x1b   :  { %270 = vmatpush1.bf16.msra.mxu0 %v1025_v9  ;;  %398 = vmatprep.subr.bf16.mxu1 %v1031_v12  ;;  %v1044_v43 = vld [vmem:[%s1365_s4 + $0x48] ss:$16 sps:$4 sm:$0xff]   ;;  %v1052_v45 = vld [vmem:[%s1365_s4 + $0x6c] ss:$16 sps:$4 sm:$0xff]   ;;  %v1047_v46 = vld [vmem:[%s1365_s4 + $0x60] ss:$16 sps:$4 sm:$0xff]  }
  0x1c   :  { %439 = vmatprep.subr.bf16.mxu0 %v1034_v13  ;;  %v1050_v47 = vld [vmem:[%s1365_s4 + $0x68] ss:$16 sps:$4 sm:$0xff]   ;;  %v1055_v48 = vld [vmem:[#allocation2 + $0x44] ss:$16 sps:$4 sm:$0xff]   ;;  %v1058_v49 = vld [vmem:[#allocation2 + $0x4c] ss:$16 sps:$4 sm:$0xff]  }
  0x1d   :  { %v1250_v52 = vsub.s32 1, %v1247_v51  ;;  %v326_v53 = vsub.s32 5, %v1247_v51  ;;  %v322_v54 = vsub.s32 3, %v1247_v51  ;;  %v330_v55 = vsub.s32 7, %v1247_v51  ;;  %v136_v58 = vld [vmem:[%s1367_s6] sm:$0xff] }
  0x1e   :  { %v1256_v56 = vsub.s32 0, %v1247_v51  ;;  %v156_v57 = vsub.s32 4, %v1247_v51  ;;  %v152_v59 = vsub.s32 2, %v1247_v51  ;;  %v160_v60 = vsub.s32 6, %v1247_v51 }
  0x1f   :  { %v319_v61 = vrot.slane %v136_v58, %v1250_v52  ;;  %v327_v62 = vrot.slane %v136_v58, %v326_v53  ;;  %v323_v63 = vrot.slane %v136_v58, %v322_v54 }
  0x20   :  { %v149_v1 = vrot.slane %v136_v58, %v1256_v56  ;;  %v153_v3 = vrot.slane %v136_v58, %v152_v59  ;;  %v161_v4 = vrot.slane %v136_v58, %v160_v60 }
  0x21   :  { %v339_v5 = vrot.slane %v319_v61, %v1250_v52  ;;  %v347_v6 = vrot.slane %v327_v62, %v1250_v52  ;;  %v343_v7 = vrot.slane %v323_v63, %v1250_v52  ;;  %v1056_v62 = vld [vmem:[#allocation2 + $0x48] ss:$16 sps:$4 sm:$0xff]   ;;  %v1061_v63 = vld [vmem:[#allocation2 + $0x64] ss:$16 sps:$4 sm:$0xff]  }
  0x22   :  { %v169_v9 = vrot.slane %v149_v1, %v1256_v56  ;;  %v173_v12 = vrot.slane %v153_v3, %v1256_v56  ;;  %v181_v13 = vrot.slane %v161_v4, %v1256_v56  ;;  %v1059_v1 = vld [vmem:[#allocation2 + $0x60] ss:$16 sps:$4 sm:$0xff]  }
  0xe8   :  { %v124_v15 = vpop.f32.mrb[0].mxu0 }
  0xe9   :  { %v125_v16 = vadd.f32 %v939_v14, %v124_v15  ;;  %v1004_v17 = vpop.f32.mrb[1].mxu0  ;;  %v42_v14 = vld [vmem:[%s1362_s1] sm:$0xff] }
  0xeb   :  { %v941_v18 = vmul.f32 -1.442695, %v125_v16 }
  0xed   :  { %1065 = vpow2.f32 %v941_v18 }
  0xf7   :  { %v1066_v19 = vpop.eup %1065 }
  0xf8   :  { %v131_v20 = vadd.f32 1.0, %v1066_v19 }
  0xfa   :  { %1067 = vrcp.f32 %v131_v20  ;;  %v43_v20 = vld [vmem:[%s1362_s1 + $0x8] sm:$0xff] }
 0x104   :  { %v1068_v21 = vpop.eup %1067 }
 0x105   :  { %v134_v22 = vmul.f32 %v1068_v21, %v125_v16  ;;  %v44_v16 = vld [vmem:[%s1362_s1 + $0x10] sm:$0xff] }
 0x107   :  { %v135_v24 = vpack.c.bf16 %v134_v22, %v134_v22  ;;  %v45_v22 = vld [vmem:[%s1362_s1 + $0x18] sm:$0xff] }
 0x109   :  { %353 = vrot.lane.b32.xlu0 %v135_v24, %s1103_s12  ;;  %950 = vmatmul.mubr.msk.bf16.vlgmr.msra.gmra.mrb[0].mxu1 %vm222_vm2, %v135_v24 }
 0x10a   :  { %951 = vmatmul.mubr.msk.bf16.vlgmr.msra.gmra.mrb[4].mxu0 %vm222_vm2, %v135_v24  ;;  %399 = vmatpush1.bf16.msra.mxu1 %v1029_v23 }
 0x10b   :  { %440 = vmatpush1.bf16.msra.mxu0 %v1032_v25  ;;  %400 = vmatprep.subr.bf16.mxu1 %v1037_v26 }
 0x10c   :  { %441 = vmatprep.subr.bf16.mxu0 %v1040_v27  ;;  %430 = vmatprep.mubr.bf16.mxu1 %v1102_v11 }
 0x10d   :  { %471 = vmatprep.mubr.bf16.mxu0 %v1102_v11 }
 0x10e   :  { %401 = vmatpush1.bf16.msra.mxu1 %v1035_v28 }
 0x10f   :  { %442 = vmatpush1.bf16.msra.mxu0 %v1038_v29  ;;  %1005 = vmatprep.subr.mxu1 %v1100_v0 }
 0x110   :  { %667 = vmatprep.subr.bf16.mxu0 %v1043_v40 }
 0x17b   :  { %v354_v31 = vpop.permute.xlu0 %353 }
 0x17c   :  { %960 = vmatmul.mubr.msk.bf16.vlgmr.msra.gmra.mrb[4].mxu1 %vm222_vm2, %v354_v31  ;;  %961 = vmatmul.mubr.msk.bf16.vlgmr.msra.gmra.mrb[8].mxu0 %vm222_vm2, %v354_v31 }
 0x17d   :  { %1006 = vmatpush3.msra.mxu1 %v962_v30  ;;  %1007 = vmatprep.mubr.msk.f32.mxu1 %vm1101_vm0, %v1100_v0  ;;  %v331_v0 = vrot.slane %v136_v58, %v330_v55 }
 0x17e   :  { %699 = vmatprep.mubr.bf16.mxu0 %v1102_v11  ;;  %708 = vmatprep.subr.bf16.mxu1 %v1046_v41 }
 0x17f   :  { %668 = vmatpush1.bf16.msra.mxu0 %v1041_v42  ;;  %v351_v8 = vrot.slane %v331_v0, %v1250_v52  ;;  %v1064_v0 = vld [vmem:[#allocation2 + $0x6c] ss:$16 sps:$4 sm:$0xff]  }
 0x180   :  { %669 = vmatprep.subr.bf16.mxu0 %v1049_v44 }
 0x183   :  { %670 = vmatpush1.bf16.msra.mxu0 %v1047_v46 }
 0x184   :  { %1008 = vmatmul.mubr.msk.f32.vlgmr.msra.gmra.mrb[8].mxu1 %vm54_vm1, %v1165_v2  ;;  %840 = vmatprep.subr.bf16.mxu0 %v1055_v48  ;;  %v157_v2 = vrot.slane %v136_v58, %v156_v57  ;;  %v1053_v58 = vld [vmem:[#allocation2 + $0x40] ss:$16 sps:$4 sm:$0xff]  }
 0x185   :  { %740 = vmatprep.mubr.bf16.mxu1 %v1102_v11  ;;  %709 = vmatpush1.bf16.msra.mxu1 %v1044_v43 }
 0x186   :  { %710 = vmatprep.subr.bf16.mxu1 %v1052_v45  ;;  %v177_v10 = vrot.slane %v157_v2, %v1256_v56  ;;  %v1062_v2 = vld [vmem:[#allocation2 + $0x68] ss:$16 sps:$4 sm:$0xff]  }
 0x189   :  { %711 = vmatpush1.bf16.msra.mxu1 %v1050_v47 }
 0x18a   :  { %881 = vmatprep.subr.bf16.mxu1 %v1058_v49 }
 0x1dc   :  { %v1215_v32 = vpop.f32.mrb[0].mxu1 }
 0x1dd   :  { %v1217_v33 = vpop.f32.mrb[4].mxu0  ;;  %v1219_v34 = vpop.f32.mrb[1].mxu1  ;;  %v261_v28 = vadd.f32 %v1215_v32, %v169_v9  ;;  %v964_v32 = vld [vmem:[%s1364_s3 + $0x1] ss:$0 sm:$0xff] }
 0x1de   :  { %v1221_v35 = vpop.f32.mrb[5].mxu0  ;;  %v264_v36 = vpop.f32.mrb[2].mxu1  ;;  %v302_v29 = vadd.f32 %v1217_v33, %v177_v10 }
 0x1df   :  { %v305_v37 = vpop.f32.mrb[6].mxu0  ;;  %v265_v38 = vpop.f32.mrb[3].mxu1 }
 0x1e0   :  { %v306_v39 = vpop.f32.mrb[7].mxu0  ;;  %v263_v38 = vadd.f32 %v1219_v34, %v173_v12 }
 0x1e1   :  { %v304_v39 = vadd.f32 %v1221_v35, %v181_v13  ;;  %v967_v13 = vld [vmem:[%s1367_s6 + $0x8] sm:$0xff] }
 0x24f   :  { %v432_v15 = vpop.f32.mrb[4].mxu1  ;;  %v473_v17 = vpop.f32.mrb[8].mxu0 }
 0x250   :  { %v433_v18 = vadd.f32 %v432_v15, %v339_v5  ;;  %v474_v19 = vadd.f32 %v473_v17, %v347_v6  ;;  %v434_v21 = vpop.f32.mrb[5].mxu1  ;;  %v475_v23 = vpop.f32.mrb[9].mxu0  ;;  %v765_v15 = vrot.slane %v967_v13, %v322_v54  ;;  %v591_v17 = vrot.slane %v967_v13, %v1256_v56 }
 0x251   :  { %v435_v24 = vadd.f32 %v434_v21, %v343_v7  ;;  %v476_v25 = vadd.f32 %v475_v23, %v351_v8  ;;  %v436_v26 = vpop.f32.mrb[6].mxu1  ;;  %v477_v27 = vpop.f32.mrb[10].mxu0 }
 0x252   :  { %v480_v30 = vmul.f32 %v433_v18, %v42_v14  ;;  %v482_v31 = vmul.f32 %v474_v19, %v44_v16  ;;  %v437_v36 = vpop.f32.mrb[7].mxu1  ;;  %v478_v37 = vpop.f32.mrb[11].mxu0  ;;  %v769_v14 = vrot.slane %v967_v13, %v326_v53  ;;  %v773_v16 = vrot.slane %v967_v13, %v330_v55 }
 0x253   :  { %v481_v40 = vmul.f32 %v435_v24, %v43_v20  ;;  %v483_v41 = vmul.f32 %v476_v25, %v45_v22  ;;  %v599_v18 = vrot.slane %v967_v13, %v156_v57  ;;  %v595_v19 = vrot.slane %v967_v13, %v152_v59 }
 0x254   :  { %v1302_v42 = vadd.f32 %v480_v30, %v261_v28  ;;  %v1304_v43 = vadd.f32 %v482_v31, %v302_v29  ;;  %v603_v20 = vrot.slane %v967_v13, %v160_v60  ;;  %v789_v53 = vrot.slane %v769_v14, %v1250_v52 }
 0x255   :  { %v1309_v44 = vadd.f32 %v481_v40, %v263_v38  ;;  %v1311_v33 = vadd.f32 %v483_v41, %v304_v39  ;;  %v785_v54 = vrot.slane %v765_v15, %v1250_v52  ;;  %v793_v22 = vrot.slane %v773_v16, %v1250_v52 }
 0x256   :  { %v611_v55 = vrot.slane %v591_v17, %v1256_v56  ;;  %v619_v23 = vrot.slane %v599_v18, %v1256_v56  ;;  %v615_v57 = vrot.slane %v595_v19, %v1256_v56  ;;  %v623_v24 = vrot.slane %v603_v20, %v1256_v56 }
 0x257   :  { %v564_v45 = vpop.f32.mrb[8].mxu1 }
 0x258   :  { %v565_v46 = vadd.f32 %v964_v32, %v564_v45  ;;  %v1009_v47 = vpop.f32.mrb[9].mxu1 }
 0x25a   :  { %v966_v34 = vmul.f32 -1.442695, %v565_v46 }
 0x25c   :  { %1069 = vpow2.f32 %v966_v34 }
 0x266   :  { %v1070_v35 = vpop.eup %1069 }
 0x267   :  { %v571_v48 = vadd.f32 1.0, %v1070_v35 }
 0x269   :  { %1071 = vrcp.f32 %v571_v48 }
 0x273   :  { %v1072_v49 = vpop.eup %1071 }
 0x274   :  { %v574_v50 = vmul.f32 %v1072_v49, %v565_v46 }
 0x276   :  { %v575_v61 = vpack.c.bf16 %v574_v50, %v574_v50 }
 0x278   :  { %795 = vrot.lane.b32.xlu0 %v575_v61, %s1103_s12  ;;  %984 = vmatmul.mubr.msk.bf16.vlgmr.msra.gmra.mrb[12].mxu0 %vm222_vm2, %v575_v61 }
 0x279   :  { %985 = vmatmul.mubr.msk.bf16.vlgmr.msra.gmra.mrb[12].mxu1 %vm222_vm2, %v575_v61  ;;  %841 = vmatpush1.bf16.msra.mxu0 %v1053_v58 }
 0x27a   :  { %882 = vmatpush1.bf16.msra.mxu1 %v1056_v62  ;;  %842 = vmatprep.subr.bf16.mxu0 %v1061_v63 }
 0x27b   :  { %883 = vmatprep.subr.bf16.mxu1 %v1064_v0  ;;  %872 = vmatprep.mubr.bf16.mxu0 %v1102_v11 }
 0x27c   :  { %913 = vmatprep.mubr.bf16.mxu1 %v1102_v11  ;;  %v761_v11 = vrot.slane %v967_v13, %v1250_v52 }
 0x27d   :  { %843 = vmatpush1.bf16.msra.mxu0 %v1059_v1 }
 0x27e   :  { %884 = vmatpush1.bf16.msra.mxu1 %v1062_v2  ;;  %v781_v21 = vrot.slane %v761_v11, %v1250_v52 }
 0x2ea   :  { %v796_v3 = vpop.permute.xlu0 %795 }
 0x2eb   :  { %994 = vmatmul.mubr.msk.bf16.vlgmr.msra.gmra.mrb[16].mxu0 %vm222_vm2, %v796_v3  ;;  %995 = vmatmul.mubr.msk.bf16.vlgmr.msra.gmra.mrb[16].mxu1 %vm222_vm2, %v796_v3 }
 0x34b   :  { %v701_v4 = vpop.f32.mrb[12].mxu0 }
 0x34c   :  { %v742_v5 = vpop.f32.mrb[12].mxu1  ;;  %v703_v6 = vpop.f32.mrb[13].mxu0  ;;  %v702_v36 = vadd.f32 %v701_v4, %v611_v55 }
 0x34d   :  { %v744_v7 = vpop.f32.mrb[13].mxu1  ;;  %v705_v8 = vpop.f32.mrb[14].mxu0  ;;  %v743_v52 = vadd.f32 %v742_v5, %v619_v23  ;;  %v704_v41 = vadd.f32 %v703_v6, %v615_v57 }
 0x34e   :  { %v746_v9 = vpop.f32.mrb[14].mxu1  ;;  %v706_v10 = vpop.f32.mrb[15].mxu0  ;;  %v745_v56 = vadd.f32 %v744_v7, %v623_v24 }
 0x34f   :  { %v747_v12 = vpop.f32.mrb[15].mxu1 }
 0x3be   :  { %v874_v59 = vpop.f32.mrb[16].mxu0  ;;  %v915_v25 = vpop.f32.mrb[16].mxu1 }
 0x3bf   :  { %v875_v51 = vadd.f32 %v874_v59, %v781_v21  ;;  %v916_v60 = vadd.f32 %v915_v25, %v789_v53  ;;  %v876_v26 = vpop.f32.mrb[17].mxu0  ;;  %v917_v27 = vpop.f32.mrb[17].mxu1 }
 0x3c0   :  { %v877_v28 = vadd.f32 %v876_v26, %v785_v54  ;;  %v918_v29 = vadd.f32 %v917_v27, %v793_v22  ;;  %v878_v30 = vpop.f32.mrb[18].mxu0  ;;  %v919_v31 = vpop.f32.mrb[18].mxu1 }
 0x3c1   :  { %v922_v37 = vmul.f32 %v875_v51, %v1302_v42  ;;  %v924_v38 = vmul.f32 %v916_v60, %v1304_v43  ;;  %v879_v39 = vpop.f32.mrb[19].mxu0  ;;  %v920_v40 = vpop.f32.mrb[19].mxu1 }
 0x3c2   :  { %v923_v32 = vmul.f32 %v877_v28, %v1309_v44  ;;  %v925_v45 = vmul.f32 %v918_v29, %v1311_v33 }
 0x3c3   :  { %v926_v46 = vadd.f32 %v922_v37, %v702_v36  ;;  %v928_v47 = vadd.f32 %v924_v38, %v743_v52 }
 0x3c4   :  { %v927_v34 = vadd.f32 %v923_v32, %v704_v41  ;;  %v929_v35 = vadd.f32 %v925_v45, %v745_v56 }
 0x3c5   :  { %930 = vst [vmem:[%s1368_s7] sm:$0xff] %v926_v46  ;;  %932 = vst [vmem:[%s1368_s7 + $0x10] sm:$0xff] %v928_v47 }
 0x3c6   :  { %931 = vst [vmem:[%s1368_s7 + $0x8] sm:$0xff] %v927_v34  ;;  %933 = vst [vmem:[%s1368_s7 + $0x18] sm:$0xff] %v929_v35 }
 0x3c7   :  { %938 = vsyncpa [#allocation3], 1 }

</bundles_post_ra>
